<compile_context>
chip_gen: v6e
topology: v6e:2x2x1
jax: 0.10.0
libtpu: 0.0.40
codegen_flags: <defaults>
</compile_context>

<pallas_src>
import math

import jax
import jax.numpy as jnp
from jax.experimental import pallas as pl
from jax.experimental.pallas import tpu as pltpu


def _ssf_kernel(gamma_ref, beta_ref, x_ref, o_ref):
    # gamma/beta: (1, TW) resident lane tiles; x/o: (TM, TW).
    # Compute in f32 (VPU slack on a mem-bound op), cast only on the store.
    x = x_ref[...].astype(jnp.float32)
    g = gamma_ref[...].astype(jnp.float32)
    b = beta_ref[...].astype(jnp.float32)
    o_ref[...] = (g * x + b).astype(o_ref.dtype)


def _sublane_pack(dtype) -> int:
    # Native packed sublane tile: 8 rows for 4-byte, 16 for 2-byte, 32 for 1-byte.
    return {4: 8, 2: 16, 1: 32}.get(jnp.dtype(dtype).itemsize, 8)


def _round_up(x: int, m: int) -> int:
    return ((x + m - 1) // m) * m


def ssf_forward(
    embedding: jax.Array,
    gamma: jax.Array,
    beta: jax.Array,
    *,
    target_block_bytes: int = 8 * 1024 * 1024,
    min_pallas_bytes: int = 1 * 1024 * 1024,
    min_row_steps: int = 4,
) -> jax.Array:
    """Applies y = gamma * embedding + beta with a Pallas TPU kernel.

    embedding: (N, C);  gamma, beta: (1, C)
    """
    n, c = embedding.shape
    assert gamma.shape == (1, c) and beta.shape == (1, c)

    out_dtype = jnp.result_type(embedding.dtype, gamma.dtype, beta.dtype)
    x_itemsize = jnp.dtype(embedding.dtype).itemsize

    # ---- small-input fast path: XLA's fused elementwise is already at roofline.
    if n == 0 or n * c * x_itemsize < min_pallas_bytes:
        return (gamma * embedding + beta).astype(out_dtype)

    # ---- lane folding: present a lane-dense (multiple-of-128) last dim when it
    # can be done as a pure reshape (no padding / row slicing copies).
    if c % 128 == 0:
        lane_fold = 1
    else:
        lane_fold = 128 // math.gcd(c, 128)
        if n % lane_fold != 0:
            # A ragged tail would need full-array pad + output-slice copies
            # (pure HBM waste on a bandwidth-bound op). Fall back to full-width
            # blocks and let Pallas mask the ragged last row block instead.
            lane_fold = 1
    w = lane_fold * c
    r = n // lane_fold

    if lane_fold > 1:
        x2 = embedding.reshape(r, w)
        g2 = jnp.tile(gamma, (1, lane_fold))
        b2 = jnp.tile(beta, (1, lane_fold))
    else:
        x2, g2, b2 = embedding, gamma, beta

    # ---- block sizing.
    pack = _sublane_pack(embedding.dtype)

    # Wide-C guard: if even `pack` rows at full width blow the per-block budget,
    # tile the lane dimension too (multiples of 128 keep stores unmasked).
    if w <= 128 or pack * w * x_itemsize <= target_block_bytes:
        tile_w = w
    else:
        tile_w = max(128, (target_block_bytes // (pack * x_itemsize)) // 128 * 128)

    rows_budget = max(pack, (target_block_bytes // (tile_w * x_itemsize)) // pack * pack)
    r_cap = max(pack, _round_up(r, pack))  # never tile beyond the (packed) array
    # Keep >= min_row_steps grid steps so both v7x TensorCores get work.
    steps_cap = max(pack, _round_up(pl.cdiv(r, min_row_steps), pack))
    tile_rows = min(rows_budget, r_cap, steps_cap)

    grid = (pl.cdiv(r, tile_rows), pl.cdiv(w, tile_w))

    out = pl.pallas_call(
        _ssf_kernel,
        out_shape=jax.ShapeDtypeStruct((r, w), out_dtype),
        grid_spec=pltpu.PrefetchScalarGridSpec(
            num_scalar_prefetch=0,
            grid=grid,
            in_specs=[
                pl.BlockSpec((1, tile_w), lambda i, j: (0, j)),          # gamma (resident)
                pl.BlockSpec((1, tile_w), lambda i, j: (0, j)),          # beta  (resident)
                pl.BlockSpec((tile_rows, tile_w), lambda i, j: (i, j)),  # embedding tile
            ],
            out_specs=pl.BlockSpec((tile_rows, tile_w), lambda i, j: (i, j)),
        ),
        compiler_params=pltpu.CompilerParams(
            dimension_semantics=("parallel", "parallel"),  # megacore / v7x 2-TC sharding
            vmem_limit_bytes=48 * 1024 * 1024,             # headroom under v7x's 64 MiB VMEM
        ),
    )(g2, b2, x2)

    # Undo the (copy-free in logical terms) lane fold.
    if lane_fold > 1:
        out = out.reshape(n, c)
    return out


if __name__ == "__main__":
    key = jax.random.PRNGKey(0)
    k_x, k_g, k_b = jax.random.split(key, 3)

    def ref(x, g, b):
        return (g * x + b).astype(jnp.result_type(x.dtype, g.dtype, b.dtype))

    c_hidden = 64
    gamma = 1.0 + 0.1 * jax.random.normal(k_g, (1, c_hidden), dtype=jnp.float32)
    beta = 0.1 * jax.random.normal(k_b, (1, c_hidden), dtype=jnp.float32)

    # 1) lane-folded path: c=64 folds x2 into a 128-lane block, multi-step row grid.
    x1 = jax.random.normal(k_x, (384, c_hidden), dtype=jnp.float32)
    o1 = jax.block_until_ready(ssf_forward(x1, gamma, beta, min_pallas_bytes=0))
    assert o1.shape == x1.shape and o1.dtype == jnp.float32
    assert jnp.allclose(o1, ref(x1, gamma, beta), atol=1e-6, rtol=1e-6)

    # 2) ragged-N path: no fold, no padding; Pallas masks the ragged last row block.
    c2 = 32
    g2 = 1.0 + 0.1 * jax.random.normal(k_g, (1, c2), dtype=jnp.float32)
    b2 = 0.1 * jax.random.normal(k_b, (1, c2), dtype=jnp.float32)
    x2 = jax.random.normal(k_x, (50, c2), dtype=jnp.float32)
    o2 = jax.block_until_ready(ssf_forward(x2, g2, b2, min_pallas_bytes=0))
    assert o2.shape == x2.shape
    assert jnp.allclose(o2, ref(x2, g2, b2), atol=1e-6, rtol=1e-6)

    # 3) wide-C guard: tiny block budget forces the 2-D (row, lane) grid.
    c3 = 512
    g3 = 1.0 + 0.1 * jax.random.normal(k_g, (1, c3), dtype=jnp.float32)
    b3 = 0.1 * jax.random.normal(k_b, (1, c3), dtype=jnp.float32)
    x3 = jax.random.normal(k_x, (128, c3), dtype=jnp.float32)
    o3 = jax.block_until_ready(
        ssf_forward(x3, g3, b3, min_pallas_bytes=0, target_block_bytes=8 * 1024))
    assert jnp.allclose(o3, ref(x3, g3, b3), atol=1e-6, rtol=1e-6)

    # 4) mixed precision: bf16 activations + f32 params -> f32 output (torch promotion).
    x4 = jax.random.normal(k_x, (128, c_hidden), dtype=jnp.bfloat16)
    o4 = jax.block_until_ready(ssf_forward(x4, gamma, beta, min_pallas_bytes=0))
    assert o4.dtype == jnp.float32
    assert jnp.allclose(o4, ref(x4, gamma, beta), atol=1e-2, rtol=1e-2)

    # 5) small-input fast path (plain fused jnp, no pallas_call launch overhead).
    x5 = jax.random.normal(k_x, (64, 32), dtype=jnp.float32)
    o5 = jax.block_until_ready(ssf_forward(x5, g2, b2))
    assert jnp.allclose(o5, ref(x5, g2, b2), atol=1e-6, rtol=1e-6)

    print("KERNEL_OK")
</pallas_src>

<mosaic_0001>
module attributes {stable_mosaic.version = 11 : i64} {
  func.func @_ssf_kernel(%arg0: i32, %arg1: i32, %arg2: memref<1x128xf32, #tpu.memory_space<vmem>>, %arg3: memref<1x128xf32, #tpu.memory_space<vmem>>, %arg4: memref<48x128xf32, #tpu.memory_space<vmem>>, %arg5: memref<48x128xf32, #tpu.memory_space<vmem>>) attributes {dimension_semantics = [#tpu.dimension_semantics<parallel>, #tpu.dimension_semantics<parallel>], iteration_bounds = array<i64: 4, 1>, scalar_prefetch = 0 : i64, scratch_operands = 0 : i64, tpu.core_type = #tpu.core_type<tc>, window_params = [{transform_indices = @transform_0, window_bounds = array<i64: 1, 128>}, {transform_indices = @transform_1, window_bounds = array<i64: 1, 128>}, {transform_indices = @transform_2, window_bounds = array<i64: 48, 128>}, {transform_indices = @transform_3, window_bounds = array<i64: 48, 128>}]} {
    %c0 = arith.constant 0 : index
    %c0_0 = arith.constant 0 : index
    %0 = vector.load %arg4[%c0, %c0_0] : memref<48x128xf32, #tpu.memory_space<vmem>>, vector<48x128xf32>
    %c0_1 = arith.constant 0 : index
    %c0_2 = arith.constant 0 : index
    %1 = vector.load %arg2[%c0_1, %c0_2] : memref<1x128xf32, #tpu.memory_space<vmem>>, vector<1x128xf32>
    %c0_3 = arith.constant 0 : index
    %c0_4 = arith.constant 0 : index
    %2 = vector.load %arg3[%c0_3, %c0_4] : memref<1x128xf32, #tpu.memory_space<vmem>>, vector<1x128xf32>
    %3 = vector.broadcast %1 : vector<1x128xf32> to vector<48x128xf32>
    %4 = arith.mulf %3, %0 : vector<48x128xf32>
    %5 = vector.broadcast %2 : vector<1x128xf32> to vector<48x128xf32>
    %6 = arith.addf %4, %5 : vector<48x128xf32>
    %c0_5 = arith.constant 0 : index
    %c0_6 = arith.constant 0 : index
    %7 = vector.load %arg5[%c0_5, %c0_6] : memref<48x128xf32, #tpu.memory_space<vmem>>, vector<48x128xf32>
    tpu.vector_store %arg5[%c0_5, %c0_6], %6 {strides = array<i32>} : memref<48x128xf32, #tpu.memory_space<vmem>>, vector<48x128xf32>,
    return
  }
  func.func @transform_0(%arg0: i32, %arg1: i32) -> (i32, i32) {
    %c0_i32 = arith.constant 0 : i32
    %c0_i32_0 = arith.constant 0 : i32
    return %c0_i32, %arg1 : i32, i32
  }
  func.func @transform_1(%arg0: i32, %arg1: i32) -> (i32, i32) {
    %c0_i32 = arith.constant 0 : i32
    %c0_i32_0 = arith.constant 0 : i32
    return %c0_i32, %arg1 : i32, i32
  }
  func.func @transform_2(%arg0: i32, %arg1: i32) -> (i32, i32) {
    %c0_i32 = arith.constant 0 : i32
    return %arg0, %arg1 : i32, i32
  }
  func.func @transform_3(%arg0: i32, %arg1: i32) -> (i32, i32) {
    %c0_i32 = arith.constant 0 : i32
    return %arg0, %arg1 : i32, i32
  }
}

</mosaic_0001>

<bundles_post_ra>
// kernel: tpu_custom_call.1
= control target key start
LH: loop header
LB: loop body
LE: loop exit
PB: predicated region body
PF: predicated region fallthrough
CT: control target
= control target key end

     0   :  { %s852_s0 = inlined_call_operand.hbm [shape: f32[1,128], index: 0, kind: input, shape index: {}]   ;;  %s853_s1 = inlined_call_operand.vmem [shape: f32[1,128], index: 1, kind: input, shape index: {}]   ;;  %s854_s2 = inlined_call_operand.hbm [shape: f32[192,128], index: 2, kind: input, shape index: {}]   ;;  %s855_s3 = inlined_call_operand.hbm [shape: f32[192,128], index: 3, kind: output, shape index: {}]  }
   0x1   :  { %857 = sst [smem:[#allocation11_spill]] %s852_s0 }
   0x2   :  { %8 = vsyncpa [#allocation3], 0 }
   0x3   :  { %9 = vsyncpa [#allocation6], 0 }
   0x4   :  { %11 = vsyncpa [#allocation6 + $0x1], 0 }
   0x5   :  { %12 = vsyncpa [#allocation4], 0 }
   0x6   :  { %14 = vsyncpa [#allocation4 + $0x1], 0  ;;  %s668_s12 = smov 0   ;;  %s670_s13 = smov 0  }
   0x7   :  { %s672_s14 = smov 0   ;;  %s674_s15 = smov 0  }
   0x8   :  { %s676_s16 = smov 0   ;;  %s678_s17 = smov 0  }
   0x9 LB: > { %s406_s18 = sadd.s32 4294967295, %s639_s17   ;;  %s407_s19 = sadd.s32 4294967294, %s639_s17   ;;  %s639_s17 = sphi %s678_s17, %s20_s17   ;;  %s635_s16 = sphi %s676_s16, %s874_s16   ;;  %s631_s15 = sphi %s674_s15, %s873_s15   ;;  %s627_s14 = sphi %s672_s14, %s872_s14   ;;  %s623_s13 = sphi %s670_s13, %s871_s13   ;;  %s619_s12 = sphi %s668_s12, %s870_s12  }
   0xa   : > { %s93_s20 = sadd.s32 1, %s627_s14  ;;  %p100_p0 = scmp.ne.s32.totalorder %s627_s14, %s623_s13 }
   0xb   : > { %p101_p1 = scmp.eq.s32.totalorder %s639_s17, 0  ;;  %p106_p2 = scmp.ne.s32.totalorder %s623_s13, %s619_s12 }
   0xc   : > { %p706_p3 = scmp.eq.s32.totalorder %s406_s18, 0  ;;  %p132_p4 = scmp.eq.s32.totalorder %s406_s18, 3 }
   0xd   : > { %p710_p5 = por %p101_p1, %p100_p0  ;;  %p138_p6 = scmp.eq.s32.totalorder %s407_s19, 3 }
   0xe   : > { %p716_p7 = por %p706_p3, %p106_p2  ;;  %p720_p8 = por %p132_p4, %p100_p0 }
   0xf   : > { %p724_p9 = por %p138_p6, %p106_p2  ;;  %p408_p10 = scmp.ge.s32.totalorder %s639_s17, 1 }
  0x10   : > { %s861_s24 = scalar_select %p720_p8, 1, 0 }
  0x11   : > { %s862_s25 = scalar_select %p724_p9, 1, 0 }
  0x12   : > { %p145_p11 = scmp.lt.s32.totalorder %s639_s17, 5  ;;  %s641_s27 = smov [#allocation2]  }
  0x13   : > { %s160_s28 = sshll.u32 %s641_s27, 4  ;;  %p445_p13 = scmp.lt.s32.totalorder %s639_s17, 4  ;;  %s161_s28 = int_to_ptr.vmem [resolvable:$true] %s160_s28 }
  0x14   : > { %p730_p12 = pnand %p408_p10, %p145_p11  ;;  %s32_s4 = sadd.s32 1, %s635_s16 }
  0x15   : > { %p739_p1 = pnand %p445_p13, %p710_p5  ;;  %p750_p4 = scmp.ge.s32.totalorder %s32_s4, 4 }
  0x16   : > { %p432_p0 = pneg %p730_p12  ;;  %s177_s6 = sand.u32 1, %s627_s14  }
  0x17   : > { %s512_s7 = scalar_lea.vmem %s161_s28, 16  ;;  %s519_s8 = scalar_lea.vmem %s161_s28, 32 }
  0x18   : > { %p745_p2 = pnand %p432_p0, %p706_p3  ;;  %p513_p10 = scmp.ne.s32.totalorder %s161_s28, %s512_s7 }
  0x19   : > { %p520_p13 = scmp.lt.s32.totalorder %s161_s28, %s161_s28  ;;  %p521_p9 = scmp.lt.s32.totalorder %s519_s8, %s512_s7 }
  0x1a   : > { %p503_p6 = pneg %p745_p2 }
  0x1b   : > { %p522_p0 = por %p521_p9, %p520_p13 }
  0x1c   : > { %p515_p5 = pnand %p513_p10, %p503_p6 }
  0x1e   : > { %p516_p11 = pneg %p515_p5 }
  0x20   : > { %p523_p8 = pnand %p522_p0, %p516_p11 }
  0x22   : > { %526 = shalt.err (!%p523_p8)
}
  0x23   : > { %s867_s0 = sld [smem:[#allocation11_spill]]  ;;  %s876_s4 = smov (%p750_p4, %s32_s4), 0 }
  0x24   : > { %s422_s11 = smul.u32 48, %s177_s6  ;;  %s88_s18 = ssub.s32 %s635_s16, %s876_s4 }
  0x25   : > { %s420_s19 = smul.u32 768, %s635_s16  ;;  %p91_p8 = scmp.eq.s32.totalorder %s88_s18, 0 }
  0x26   : > { %s181_s7 = scalar_lea.vmem [#allocation5], %s422_s11  ;;  %s178_s10 = scalar_lea.sflag [#allocation6], %s177_s6 }
  0x27   : > { %s188_s30 = scalar_lea.hbm %s854_s2, %s420_s19  ;;  %s189_s8 = sshll.u32 %s181_s7, 4  ;;  %s190_s8 = int_to_ptr.vmem [resolvable:$true] %s189_s8 }
  0x28   : > { %s775_s9 = scalar_select %p91_p8, %s627_s14, %s93_s20  }
  0x29   : > { %435 = dma.hbm_to_vmem [thread:$0]  (!%p745_p2), %s867_s0, 16, %s161_s28, [#allocation3]  }
  0x2a   : > { %p529_p9 = pneg %p739_p1  ;;  %s540_s28 = scalar_lea.vmem %s190_s8, 768 }
  0x2b   : > { %p541_p2 = scmp.ne.s32.totalorder %s190_s8, %s540_s28  ;;  %s642_s5 = smov [#allocation5]  }
  0x2c   : > { %s545_s0 = sshll.u32 %s642_s5, 4  ;;  %s546_s0 = int_to_ptr.vmem [resolvable:$false] %s545_s0 }
  0x2d   : > { %p543_p4 = pnand %p541_p2, %p529_p9  ;;  %s547_s18 = scalar_lea.vmem %s546_s0, 1536 }
  0x2e   : > { %p548_p10 = scmp.lt.s32.totalorder %s190_s8, %s546_s0  ;;  %p549_p5 = scmp.lt.s32.totalorder %s547_s18, %s540_s28 }
  0x2f   : > { %p544_p6 = pneg %p543_p4 }
  0x30   : > { %p550_p11 = por %p549_p5, %p548_p10 }
  0x32   : > { %p551_p13 = pnand %p550_p11, %p544_p6 }
  0x34   : > { %554 = shalt.err (!%p551_p13)
}
  0x35   : > { %s643_s11 = smov 128   ;;  %s644_s20 = smov 8  }
  0x36   : > { %439 = dma.hbm_to_vmem [thread:$0]  (!%p739_p1), %s188_s30, 768, %s190_s8, %s178_s10, %s643_s11, %s643_s11, %s644_s20  }
  0x37   : > { %201 = sbr.rel (%p730_p12) target bundleno = 92 (0x5c), region = 32 }
  0x3c   : > { %606 = dma.done.wait (%p706_p3), [#allocation3], 16  }
  0x3d   : > { %608 = vsyncadd (%p706_p3), [#allocation3], 4294967280  ;;  %s788_s0 = sand.u32 1, %s623_s13  }
  0x3e   : > { %s423_s6 = smul.u32 48, %s788_s0  ;;  %s208_s19 = scalar_lea.sflag [#allocation6], %s788_s0 }
  0x40   : > { %s211_s22 = scalar_lea.vmem [#allocation5], %s423_s6 }
  0x41   : > { %610 = dma.done.wait (%p716_p7), %s208_s19, 768  }
  0x42   : > { %612 = vsyncadd (%p716_p7), %s208_s19, 4294966528  ;;  %v242_v0 = vld [vmem:[%s211_s22] sm:$0xff]  ;;  %v415_v1 = vld [vmem:[#allocation2] ss:$0 sm:$0xff]  ;;  %s236_s29 = scalar_lea.vmem [#allocation7], %s423_s6  ;;  %s421_s30 = smul.u32 768, %s631_s15 }
  0x43   : > { %v416_v2 = vld [vmem:[%s853_s1] ss:$0 sm:$0xff]  ;;  %v256_v3 = vmul.f32 %v415_v1, %v242_v0  ;;  %s295_s27 = sshll.u32 %s236_s29, 4  ;;  %v244_v5 = vld [vmem:[%s211_s22 + $0x10] sm:$0xff]  ;;  %v246_v10 = vld [vmem:[%s211_s22 + $0x20] sm:$0xff]  ;;  %s281_s8 = scalar_lea.sflag [#allocation4], %s788_s0  ;;  %s800_s27 = int_to_ptr.vmem [resolvable:$true] %s295_s27 }
  0x44   : > { %v243_v4 = vld [vmem:[%s211_s22 + $0x8] sm:$0xff]  ;;  %v245_v6 = vld [vmem:[%s211_s22 + $0x18] sm:$0xff]  ;;  %v258_v8 = vmul.f32 %v415_v1, %v244_v5  ;;  %v260_v13 = vmul.f32 %v415_v1, %v246_v10  ;;  %s805_s7 = scalar_lea.hbm %s855_s3, %s421_s30  ;;  %s555_s10 = scalar_lea.vmem %s800_s27, 768 }
  0x45   : > { %v257_v7 = vmul.f32 %v415_v1, %v243_v4  ;;  %v259_v9 = vmul.f32 %v415_v1, %v245_v6  ;;  %v247_v11 = vld [vmem:[%s211_s22 + $0x28] sm:$0xff]  ;;  %v268_v12 = vadd.f32 %v416_v2, %v256_v3  ;;  %p556_p3 = scmp.ne.s32.totalorder %s800_s27, %s555_s10  ;;  %p868_p7 = scmp.ne.s32.totalorder %s861_s24, 0 }
  0x46   : > { %v261_v14 = vmul.f32 %v415_v1, %v247_v11  ;;  %v270_v16 = vadd.f32 %v416_v2, %v258_v8  ;;  %v272_v18 = vadd.f32 %v416_v2, %v260_v13  ;;  %s645_s28 = smov [#allocation7]  }
  0x47   : > { %v269_v15 = vadd.f32 %v416_v2, %v257_v7  ;;  %v271_v17 = vadd.f32 %v416_v2, %v259_v9  ;;  %274 = vst [vmem:[%s236_s29] sm:$0xff] %v268_v12  ;;  %p557_p12 = pnand %p556_p3, %p868_p7  ;;  %s559_s5 = sshll.u32 %s645_s28, 4  ;;  %s560_s5 = int_to_ptr.vmem [resolvable:$false] %s559_s5 }
  0x48   : > { %v273_v19 = vadd.f32 %v416_v2, %v261_v14  ;;  %276 = vst [vmem:[%s236_s29 + $0x10] sm:$0xff] %v270_v16  ;;  %278 = vst [vmem:[%s236_s29 + $0x20] sm:$0xff] %v272_v18  ;;  %s561_s18 = scalar_lea.vmem %s560_s5, 1536  ;;  %p562_p0 = scmp.lt.s32.totalorder %s800_s27, %s560_s5 }
  0x49   : > { %275 = vst [vmem:[%s236_s29 + $0x8] sm:$0xff] %v269_v15  ;;  %277 = vst [vmem:[%s236_s29 + $0x18] sm:$0xff] %v271_v17  ;;  %p558_p1 = pneg %p557_p12  ;;  %p563_p8 = scmp.lt.s32.totalorder %s561_s18, %s555_s10 }
  0x4a   : > { %279 = vst [vmem:[%s236_s29 + $0x28] sm:$0xff] %v273_v19 }
  0x4b   : > { %p564_p9 = por %p563_p8, %p562_p0 }
  0x4d   : > { %p565_p2 = pnand %p564_p9, %p558_p1 }
  0x4f   : > { %568 = shalt.err (!%p565_p2)
}
  0x50   : > { %s569_s11 = scalar_lea.hbm %s805_s7, 768  ;;  %s573_s19 = scalar_lea.hbm %s855_s3, 3072 }
  0x51   : > { %p570_p4 = scmp.ne.s32.totalorder %s805_s7, %s569_s11  ;;  %p574_p5 = scmp.lt.s32.totalorder %s805_s7, %s855_s3 }
  0x52   : > { %p575_p11 = scmp.lt.s32.totalorder %s573_s19, %s569_s11 }
  0x53   : > { %p571_p6 = pnand %p570_p4, %p868_p7 }
  0x54   : > { %p576_p13 = por %p575_p11, %p574_p5 }
  0x55   : > { %p572_p10 = pneg %p571_p6 }
  0x57   : > { %p577_p3 = pnand %p576_p13, %p572_p10 }
  0x59   : > { %580 = shalt.err (!%p577_p3)
}
  0x5a   : > { %s646_s21 = smov 128   ;;  %s647_s29 = smov 8  }
  0x5b   : > { %430 = dma.vmem_to_hbm [thread:$0]  (%p868_p7), %s800_s27, 768, %s805_s7, %s281_s8, %s646_s21, %s646_s21, %s647_s29  }
  0x5c PF: > { %p447_p12 = scmp.ge.s32.totalorder %s639_s17, 2  ;;  %s310_s30 = sand.u32 1, %s619_s12  }
  0x5d   : > { %p869_p1 = scmp.ne.s32.totalorder %s862_s25, 0  ;;  %s311_s15 = scalar_lea.sflag [#allocation4], %s310_s30 }
  0x5f   : > { %p441_p0 = pnand %p447_p12, %p869_p1 }
  0x61   : > { %p442_p8 = pneg %p441_p0 }
  0x63   : > { %614 = dma.done.wait (%p442_p8), %s311_s15, 768  }
  0x64   : > { %616 = vsyncadd (%p442_p8), %s311_s15, 4294966528  ;;  %s20_s17 = sadd.s32 1, %s639_s17   ;;  %s870_s12 = smov %s623_s13 }
  0x65   : > { %p17_p9 = scmp.ge.s32.totalorder %s20_s17, 6   ;;  %s871_s13 = smov %s627_s14 }
  0x66   : > { %s872_s14 = smov %s775_s9  ;;  %s873_s15 = smov %s635_s16 }
  0x67   : > { %s874_s16 = smov %s876_s4  ;;  %19 = sbr.rel (!%p17_p9) target bundleno = 9 (0x9), region = 86 }
  0x6c   :  { %316 = vsyncpa [#allocation3], 1 }
  0x6d   :  { %318 = vsyncpa [#allocation3 + $0x1], 1 }
  0x6e   :  { %319 = vsyncpa [#allocation6], 1 }
  0x6f   :  { %321 = vsyncpa [#allocation6 + $0x1], 1 }
  0x70   :  { %322 = vsyncpa [#allocation4], 1 }
  0x71   :  { %324 = vsyncpa [#allocation4 + $0x1], 1 }

</bundles_post_ra>
